<compile_context>
chip_gen: v5e
topology: v5e:2x2
jax: 0.10.0
libtpu: 0.0.40
codegen_flags: <defaults>
</compile_context>

<pallas_src>
import functools

import jax
import jax.numpy as jnp
from jax.experimental import pallas as pl
from jax.experimental.pallas import tpu as pltpu

BN_EPS = 1e-3
LANES = 128
SUBLANES = 8


def _round_up(x, m):
    return (x + m - 1) // m * m


def _pick_tile_rows(m8, c_pad, target_bytes=2 << 20):
    """Largest sublane-aligned row-tile with ~target_bytes of f32 per tile."""
    rows = max(SUBLANES, (target_bytes // (4 * c_pad)) // SUBLANES * SUBLANES)
    return min(rows, m8)


def bn_stats_kernel(x_ref, gb_ref, ss_ref, sum_acc, sq_acc, *, inv_count, eps):
    """Pass 1: accumulate per-channel sum / sum-of-squares over all row tiles,
    then fold batch mean/var + gamma/beta into per-channel scale (row 0) and
    shift (row 1) so pass 2 is a single FMA per element."""
    i = pl.program_id(0)

    @pl.when(i == 0)
    def _init():
        sum_acc[...] = jnp.zeros_like(sum_acc)
        sq_acc[...] = jnp.zeros_like(sq_acc)

    x = x_ref[...]                                       # (TM, Cpad) f32
    sum_acc[...] += jnp.sum(x, axis=0, keepdims=True)    # VALU adds + 1 XLU reduce
    sq_acc[...] += jnp.sum(x * x, axis=0, keepdims=True)

    @pl.when(i == pl.num_programs(0) - 1)
    def _finalize():
        mean = sum_acc[...] * inv_count
        var = sq_acc[...] * inv_count - mean * mean      # biased variance (PyTorch BN)
        s = gb_ref[0:1, :] * jax.lax.rsqrt(var + eps)    # rsqrt -> EUP slot
        ss_ref[0:1, :] = s
        ss_ref[1:2, :] = gb_ref[1:2, :] - mean * s


def bn_apply_relu_kernel(x_ref, ss_ref, o_ref):
    """Pass 2: per-channel FMA (y = x*s + t) + ReLU on a lane-dense tile."""
    s = ss_ref[0:1, :]
    t = ss_ref[1:2, :]
    o_ref[...] = jnp.maximum(x_ref[...] * s + t, 0.0)


def cat_bn_act_forward(xs, gamma, beta, *, eps=BN_EPS, block_rows=None):
    """Equivalent of CatBnAct.forward: act(bn(cat(xs, dim=1))) with BN in its
    default (training-mode, batch-statistics) behaviour. `xs` is an NCHW array
    or a tuple of NCHW arrays sharing (N, H, W)."""
    if not isinstance(xs, (tuple, list)):
        xs = (xs,)

    out_dtype = jnp.result_type(*[t.dtype for t in xs])
    n, _, h, w = xs[0].shape
    # channel-cat done channels-last so the kernels see lanes = channels
    x_nhwc = jnp.concatenate(
        [jnp.transpose(t, (0, 2, 3, 1)).astype(jnp.float32) for t in xs], axis=-1)
    c = x_nhwc.shape[-1]
    m = n * h * w

    # lane-dense channel padding; row padding to a whole number of tiles.
    # Zero-padded rows/lanes do not disturb the statistics because we divide
    # by the true element count `m` (they contribute 0 to sum and sum-sq).
    c_pad = _round_up(c, LANES)
    m8 = _round_up(m, SUBLANES)
    if block_rows is None:
        tm = _pick_tile_rows(m8, c_pad)
    else:
        tm = min(_round_up(block_rows, SUBLANES), m8)
    m_pad = _round_up(m, tm)
    n_tiles = m_pad // tm

    x2d = x_nhwc.reshape(m, c)
    if (m_pad, c_pad) != (m, c):
        x2d = jnp.pad(x2d, ((0, m_pad - m), (0, c_pad - c)))
    # gamma (row 0, pad with 1s) and beta (row 1, pad with 0s) packed together
    gb = jnp.stack(
        [jnp.pad(gamma.astype(jnp.float32), (0, c_pad - c), constant_values=1.0),
         jnp.pad(beta.astype(jnp.float32), (0, c_pad - c))], axis=0)

    row_spec = pl.BlockSpec((tm, c_pad), lambda i: (i, 0))
    chan_spec = pl.BlockSpec((2, c_pad), lambda i: (0, 0))

    # ---- pass 1: batch statistics -> folded per-channel scale / shift ----
    scale_shift = pl.pallas_call(
        functools.partial(bn_stats_kernel, inv_count=1.0 / m, eps=eps),
        grid=(n_tiles,),
        in_specs=[row_spec, chan_spec],
        out_specs=chan_spec,
        out_shape=jax.ShapeDtypeStruct((2, c_pad), jnp.float32),
        scratch_shapes=[pltpu.VMEM((1, c_pad), jnp.float32),
                        pltpu.VMEM((1, c_pad), jnp.float32)],
        compiler_params=pltpu.CompilerParams(
            dimension_semantics=("arbitrary",)),      # reduction over row tiles
    )(x2d, gb)

    # ---- pass 2: normalize + ReLU (independent tiles -> megacore parallel) ----
    y2d = pl.pallas_call(
        bn_apply_relu_kernel,
        grid=(n_tiles,),
        in_specs=[row_spec, chan_spec],
        out_specs=row_spec,
        out_shape=jax.ShapeDtypeStruct((m_pad, c_pad), jnp.float32),
        input_output_aliases={0: 0},                  # reuse staged x2d buffer
        compiler_params=pltpu.CompilerParams(
            dimension_semantics=("parallel",)),
    )(x2d, scale_shift)

    # back to NCHW to match the PyTorch module's output layout / dtype
    y = y2d[:m, :c].reshape(n, h, w, c).transpose(0, 3, 1, 2)
    return y.astype(out_dtype)


def _reference(xs, gamma, beta, eps=BN_EPS):
    x = jnp.concatenate(xs, axis=1).astype(jnp.float32)
    mean = jnp.mean(x, axis=(0, 2, 3), keepdims=True)
    var = jnp.mean(jnp.square(x - mean), axis=(0, 2, 3), keepdims=True)
    y = (x - mean) * jax.lax.rsqrt(var + eps)
    y = y * gamma.reshape(1, -1, 1, 1) + beta.reshape(1, -1, 1, 1)
    return jnp.maximum(y, 0.0)


if __name__ == "__main__":
    key = jax.random.PRNGKey(0)
    k1, k2, k3, k4 = jax.random.split(key, 4)

    n, h, w = 2, 16, 16
    c1, c2 = 24, 8                 # CatBnAct receives a (dense, residual) tuple
    in_chs = c1 + c2

    x1 = jax.random.normal(k1, (n, c1, h, w), jnp.float32)
    x2 = jax.random.normal(k2, (n, c2, h, w), jnp.float32)
    gamma = 1.0 + 0.1 * jax.random.normal(k3, (in_chs,), jnp.float32)
    beta = 0.1 * jax.random.normal(k4, (in_chs,), jnp.float32)

    ref = _reference((x1, x2), gamma, beta)

    # small block_rows exercises the multi-tile accumulation path
    # (M = 512 -> 4 row tiles); the default adaptive tile covers the
    # single-tile / large-tile path.
    out_small = cat_bn_act_forward((x1, x2), gamma, beta, block_rows=128)
    out_small = jax.block_until_ready(out_small)
    assert out_small.shape == (n, in_chs, h, w), out_small.shape
    assert bool(jnp.all(jnp.isfinite(out_small)))
    assert bool(jnp.allclose(out_small, ref, atol=1e-4, rtol=1e-4)), float(
        jnp.max(jnp.abs(out_small - ref)))

    out_auto = cat_bn_act_forward((x1, x2), gamma, beta)
    out_auto = jax.block_until_ready(out_auto)
    assert bool(jnp.allclose(out_auto, ref, atol=1e-4, rtol=1e-4)), float(
        jnp.max(jnp.abs(out_auto - ref)))

    print("KERNEL_OK")
</pallas_src>

<mosaic_0001>
module attributes {stable_mosaic.version = 11 : i64} {
  func.func @bn_stats_kernel(%arg0: i32, %arg1: memref<128x128xf32, #tpu.memory_space<vmem>>, %arg2: memref<2x128xf32, #tpu.memory_space<vmem>>, %arg3: memref<2x128xf32, #tpu.memory_space<vmem>>, %arg4: memref<1x128xf32, #tpu.memory_space<vmem>>, %arg5: memref<1x128xf32, #tpu.memory_space<vmem>>) attributes {dimension_semantics = [#tpu.dimension_semantics<arbitrary>], iteration_bounds = array<i64: 4>, scalar_prefetch = 0 : i64, scratch_operands = 2 : i64, tpu.core_type = #tpu.core_type<tc>, window_params = [{transform_indices = @transform_0, window_bounds = array<i64: 128, 128>}, {pipeline_mode = #tpu.pipeline_mode<synchronous>, transform_indices = @transform_1, window_bounds = array<i64: 2, 128>}, {pipeline_mode = #tpu.pipeline_mode<synchronous>, transform_indices = @transform_2, window_bounds = array<i64: 2, 128>}]} {
    %c0_i32 = arith.constant 0 : i32
    %0 = arith.cmpi eq, %arg0, %c0_i32 : i32
    %1 = arith.extui %0 : i1 to i32
    %c0_i32_0 = arith.constant 0 : i32
    %2 = arith.cmpi ne, %1, %c0_i32_0 : i32
    scf.if %2 {
      %cst_12 = arith.constant 0.000000e+00 : f32
      %18 = vector.broadcast %cst_12 : f32 to vector<1x128xf32>
      %c0_13 = arith.constant 0 : index
      %c0_14 = arith.constant 0 : index
      %19 = vector.load %arg4[%c0_13, %c0_14] : memref<1x128xf32, #tpu.memory_space<vmem>>, vector<1x128xf32>
      tpu.vector_store %arg4[%c0_13, %c0_14], %18 {strides = array<i32>} : memref<1x128xf32, #tpu.memory_space<vmem>>, vector<1x128xf32>,
      %cst_15 = arith.constant 0.000000e+00 : f32
      %20 = vector.broadcast %cst_15 : f32 to vector<1x128xf32>
      %c0_16 = arith.constant 0 : index
      %c0_17 = arith.constant 0 : index
      %21 = vector.load %arg5[%c0_16, %c0_17] : memref<1x128xf32, #tpu.memory_space<vmem>>, vector<1x128xf32>
      tpu.vector_store %arg5[%c0_16, %c0_17], %20 {strides = array<i32>} : memref<1x128xf32, #tpu.memory_space<vmem>>, vector<1x128xf32>,
    } else {
    }
    %c0 = arith.constant 0 : index
    %c0_1 = arith.constant 0 : index
    %3 = vector.load %arg1[%c0, %c0_1] : memref<128x128xf32, #tpu.memory_space<vmem>>, vector<128x128xf32>
    %c0_2 = arith.constant 0 : index
    %c0_3 = arith.constant 0 : index
    %4 = vector.load %arg4[%c0_2, %c0_3] : memref<1x128xf32, #tpu.memory_space<vmem>>, vector<1x128xf32>
    %cst = arith.constant dense<0.000000e+00> : vector<128xf32>
    %5 = vector.multi_reduction <add>, %3, %cst [0] : vector<128x128xf32> to vector<128xf32>
    %6 = vector.shape_cast %5 : vector<128xf32> to vector<1x128xf32>
    %7 = arith.addf %4, %6 : vector<1x128xf32>
    %c0_4 = arith.constant 0 : index
    %c0_5 = arith.constant 0 : index
    %8 = vector.load %arg4[%c0_4, %c0_5] : memref<1x128xf32, #tpu.memory_space<vmem>>, vector<1x128xf32>
    tpu.vector_store %arg4[%c0_4, %c0_5], %7 {strides = array<i32>} : memref<1x128xf32, #tpu.memory_space<vmem>>, vector<1x128xf32>,
    %c0_6 = arith.constant 0 : index
    %c0_7 = arith.constant 0 : index
    %9 = vector.load %arg5[%c0_6, %c0_7] : memref<1x128xf32, #tpu.memory_space<vmem>>, vector<1x128xf32>
    %10 = arith.mulf %3, %3 : vector<128x128xf32>
    %cst_8 = arith.constant dense<0.000000e+00> : vector<128xf32>
    %11 = vector.multi_reduction <add>, %10, %cst_8 [0] : vector<128x128xf32> to vector<128xf32>
    %12 = vector.shape_cast %11 : vector<128xf32> to vector<1x128xf32>
    %13 = arith.addf %9, %12 : vector<1x128xf32>
    %c0_9 = arith.constant 0 : index
    %c0_10 = arith.constant 0 : index
    %14 = vector.load %arg5[%c0_9, %c0_10] : memref<1x128xf32, #tpu.memory_space<vmem>>, vector<1x128xf32>
    tpu.vector_store %arg5[%c0_9, %c0_10], %13 {strides = array<i32>} : memref<1x128xf32, #tpu.memory_space<vmem>>, vector<1x128xf32>,
    %c3_i32 = arith.constant 3 : i32
    %15 = arith.cmpi eq, %arg0, %c3_i32 : i32
    %16 = arith.extui %15 : i1 to i32
    %c0_i32_11 = arith.constant 0 : i32
    %17 = arith.cmpi ne, %16, %c0_i32_11 : i32
    scf.if %17 {
      %c0_12 = arith.constant 0 : index
      %c0_13 = arith.constant 0 : index
      %18 = vector.load %arg4[%c0_12, %c0_13] : memref<1x128xf32, #tpu.memory_space<vmem>>, vector<1x128xf32>
      %cst_14 = arith.constant 0.001953125 : f32
      %19 = vector.broadcast %cst_14 : f32 to vector<1x128xf32>
      %20 = arith.mulf %18, %19 : vector<1x128xf32>
      %c0_15 = arith.constant 0 : index
      %c0_16 = arith.constant 0 : index
      %21 = vector.load %arg5[%c0_15, %c0_16] : memref<1x128xf32, #tpu.memory_space<vmem>>, vector<1x128xf32>
      %cst_17 = arith.constant 0.001953125 : f32
      %22 = vector.broadcast %cst_17 : f32 to vector<1x128xf32>
      %23 = arith.mulf %21, %22 : vector<1x128xf32>
      %24 = arith.mulf %20, %20 : vector<1x128xf32>
      %25 = arith.subf %23, %24 : vector<1x128xf32>
      %c0_18 = arith.constant 0 : index
      %c0_19 = arith.constant 0 : index
      %26 = vector.load %arg2[%c0_18, %c0_19] : memref<2x128xf32, #tpu.memory_space<vmem>>, vector<1x128xf32>
      %cst_20 = arith.constant 1.000000e-03 : f32
      %27 = vector.broadcast %cst_20 : f32 to vector<1x128xf32>
      %28 = arith.addf %25, %27 : vector<1x128xf32>
      %29 = math.rsqrt %28 : vector<1x128xf32>
      %30 = arith.mulf %26, %29 : vector<1x128xf32>
      %c0_21 = arith.constant 0 : index
      %c0_22 = arith.constant 0 : index
      %31 = vector.load %arg3[%c0_21, %c0_22] : memref<2x128xf32, #tpu.memory_space<vmem>>, vector<1x128xf32>
      tpu.vector_store %arg3[%c0_21, %c0_22], %30 {strides = array<i32>} : memref<2x128xf32, #tpu.memory_space<vmem>>, vector<1x128xf32>,
      %c1 = arith.constant 1 : index
      %c0_23 = arith.constant 0 : index
      %32 = vector.load %arg2[%c1, %c0_23] : memref<2x128xf32, #tpu.memory_space<vmem>>, vector<1x128xf32>
      %33 = arith.mulf %20, %30 : vector<1x128xf32>
      %34 = arith.subf %32, %33 : vector<1x128xf32>
      %c1_24 = arith.constant 1 : index
      %c0_25 = arith.constant 0 : index
      %35 = vector.load %arg3[%c1_24, %c0_25] : memref<2x128xf32, #tpu.memory_space<vmem>>, vector<1x128xf32>
      tpu.vector_store %arg3[%c1_24, %c0_25], %34 {strides = array<i32>} : memref<2x128xf32, #tpu.memory_space<vmem>>, vector<1x128xf32>,
    } else {
    }
    return
  }
  func.func @transform_0(%arg0: i32) -> (i32, i32) {
    %c0_i32 = arith.constant 0 : i32
    %c0_i32_0 = arith.constant 0 : i32
    return %arg0, %c0_i32 : i32, i32
  }
  func.func @transform_1(%arg0: i32) -> (i32, i32) {
    %c0_i32 = arith.constant 0 : i32
    %c0_i32_0 = arith.constant 0 : i32
    %c0_i32_1 = arith.constant 0 : i32
    return %c0_i32, %c0_i32_0 : i32, i32
  }
  func.func @transform_2(%arg0: i32) -> (i32, i32) {
    %c0_i32 = arith.constant 0 : i32
    %c0_i32_0 = arith.constant 0 : i32
    %c0_i32_1 = arith.constant 0 : i32
    return %c0_i32, %c0_i32_0 : i32, i32
  }
}

</mosaic_0001>

<bundles_post_ra>
// kernel: tpu_custom_call.1
= control target key start
LH: loop header
LB: loop body
LE: loop exit
PB: predicated region body
PF: predicated region fallthrough
CT: control target
= control target key end

     0   :  { %7 = vsyncpa [#allocation5], 0  ;;  %s712_s0 = inlined_call_operand.hbm [shape: f32[512,128], index: 0, kind: input, shape index: {}]   ;;  %s713_s1 = inlined_call_operand.hbm [shape: f32[2,128], index: 1, kind: input, shape index: {}]   ;;  %s714_s2 = inlined_call_operand.hbm [shape: f32[2,128], index: 2, kind: output, shape index: {}]  }
   0x1   :  { %9 = vsyncpa [#allocation5 + $0x1], 0 }
   0x2   :  { %10 = vsyncpa [#allocation8], 0 }
   0x3   :  { %11 = vsyncpa [#allocation6], 0  ;;  %s582_s9 = smov 0   ;;  %s584_s10 = smov 0  }
   0x4   :  { %s586_s11 = smov 0   ;;  %s588_s12 = smov 0  }
   0x5 LB: > { %s601_s13 = sadd.s32 4294967295, %s560_s12   ;;  %s604_s14 = sadd.s32 1, %s560_s12   ;;  %s560_s12 = sphi %s588_s12, %s722_s12   ;;  %s556_s11 = sphi %s586_s11, %s721_s11   ;;  %s552_s10 = sphi %s584_s10, %s720_s10   ;;  %s548_s9 = sphi %s582_s9, %s719_s9  }
   0x6   : > { %s21_s15 = ssub.s32 %s560_s12, %s604_s14  ;;  %s24_s16 = sadd.s32 1, %s556_s11 }
   0x7   : > { %p22_p0 = scmp.eq.s32.totalorder %s21_s15, 0  ;;  %p31_p1 = scmp.ne.s32.totalorder %s556_s11, %s552_s10 }
   0x8   : > { %p32_p2 = scmp.eq.s32.totalorder %s560_s12, 0  ;;  %p37_p3 = scmp.ne.s32.totalorder %s552_s10, %s548_s9 }
   0x9   : > { %s614_s17 = scalar_select %p22_p0, %s556_s11, %s24_s16  }
   0xa   : > { %p616_p4 = por %p32_p2, %p31_p1  ;;  %p38_p5 = scmp.eq.s32.totalorder %s601_s13, 0 }
   0xb   : > { %p352_p6 = scmp.ge.s32.totalorder %s560_s12, 1  ;;  %p90_p7 = scmp.lt.s32.totalorder %s560_s12, 5 }
   0xc   : > { %p625_p8 = por %p38_p5, %p37_p3  ;;  %p353_p9 = scmp.ne.s32.totalorder %s601_s13, 0 }
   0xd   : > { %p630_p10 = pnand %p352_p6, %p90_p7  ;;  %s102_s23 = sshll.u32 %s713_s1, 4  ;;  %s103_s23 = int_to_ptr.hbm [resolvable:$true] %s102_s23 }
   0xe   : > { %s562_s24 = smov [#allocation7]   ;;  %p387_p13 = scmp.lt.s32.totalorder %s560_s12, 4 }
   0xf   : > { %p378_p11 = pneg %p630_p10  ;;  %s104_s25 = sshll.u32 %s562_s24, 4  ;;  %s105_s25 = int_to_ptr.vmem [resolvable:$true] %s104_s25 }
  0x10   : > { %s115_s26 = sand.u32 1, %s556_s11   ;;  %s367_s27 = sshll.u32 %s560_s12, 7 }
  0x11   : > { %p379_p12 = pnand %p378_p11, %p38_p5  ;;  %p646_p0 = pnand %p387_p13, %p616_p4 }
  0x12   : > { %s355_s29 = sshll.u32 %s115_s26, 7  ;;  %s124_s4 = scalar_lea.hbm %s712_s0, %s367_s27 }
  0x13   : > { %381 = dma.hbm_to_vmem [thread:$0]  (!%p379_p12), %s103_s23, 32, %s105_s25, [#allocation8]  }
  0x14   : > { %s125_s5 = sshll.u32 %s124_s4, 4  ;;  %s119_s6 = scalar_lea.vmem [#allocation4], %s355_s29  ;;  %s126_s5 = int_to_ptr.hbm [resolvable:$true] %s125_s5 }
  0x15   : > { %s127_s7 = sshll.u32 %s119_s6, 4  ;;  %s116_s8 = scalar_lea.sflag [#allocation5], %s115_s26  ;;  %s128_s7 = int_to_ptr.vmem [resolvable:$true] %s127_s7 }
  0x16   : > { %s460_s9 = sshra.s32 %s126_s5, 4  ;;  %p464_p2 = pneg %p646_p0  ;;  %s461_s9 = int_to_ptr.hbm [resolvable:$true] %s460_s9 }
  0x17   : > { %s462_s12 = scalar_lea.hbm %s461_s9, 128  ;;  %s467_s18 = scalar_lea.hbm %s712_s0, 512 }
  0x18   : > { %p463_p1 = scmp.ne.s32.totalorder %s461_s9, %s462_s12  ;;  %p468_p6 = scmp.lt.s32.totalorder %s461_s9, %s712_s0 }
  0x19   : > { %p469_p7 = scmp.lt.s32.totalorder %s467_s18, %s462_s12 }
  0x1a   : > { %p465_p3 = pnand %p464_p2, %p463_p1 }
  0x1b   : > { %p470_p11 = por %p469_p7, %p468_p6 }
  0x1c   : > { %p466_p4 = pneg %p465_p3 }
  0x1e   : > { %p471_p12 = pnand %p470_p11, %p466_p4 }
  0x20   : > { %474 = shalt.err (!%p471_p12)
}
  0x21   : > { %s563_s23 = smov 128   ;;  %s564_s24 = smov 8  }
  0x22   : > { %385 = dma.hbm_to_vmem [thread:$0]  (!%p646_p0), %s126_s5, 2048, %s128_s7, %s116_s8, %s563_s23, %s563_s23, %s564_s24  }
  0x23   : > { %139 = sbr.rel (%p630_p10) target bundleno = 142 (0x8e), region = 28  ;;  %s141_s25 = sand.u32 (!%p630_p10), 1, %s552_s10  }
  0x24   : > { %s359_s26 = sshll.u32 (!%p630_p10), %s141_s25, 7  ;;  %s142_s27 = scalar_lea.sflag (!%p630_p10), [#allocation5], %s141_s25 }
  0x25   : > { %s666_s29 = scalar_lea.vmem (!%p630_p10), [#allocation4], %s359_s26 }
  0x28   : > { %535 = dma.done.wait (%p625_p8), %s142_s27, 2048  }
  0x29   : > { %537 = vsyncadd (%p625_p8), %s142_s27, 4294965248 }
  0x2a   : > { %539 = dma.done.wait (%p38_p5), [#allocation8], 32  }
  0x2b   : > { %541 = vsyncadd (%p38_p5), [#allocation8], 4294967264  ;;  %171 = sbr.rel (%p353_p9) target bundleno = 51 (0x33), region = 40 }
  0x30   : > { %v565_v0 = vmov 0.0  }
  0x31   : > { %172 = vst [vmem:[#allocation2] sm:$0x1] %v565_v0 }
  0x32   : > { %173 = vst [vmem:[#allocation3] sm:$0x1] %v565_v0 }
  0x33 PF: > { %v174_v1 = vld [vmem:[%s666_s29] sm:$0xff]  ;;  %v175_v2 = vld [vmem:[%s666_s29 + $0x8] sm:$0xff]  ;;  %v176_v3 = vld [vmem:[%s666_s29 + $0x10] sm:$0xff]  ;;  %p362_p5 = scmp.ne.s32.totalorder %s601_s13, 3 }
  0x34   : > { %v177_v4 = vld [vmem:[%s666_s29 + $0x18] sm:$0xff]  ;;  %v191_v5 = vadd.f32 %v175_v2, %v174_v1  ;;  %v215_v6 = vmul.f32 %v174_v1, %v174_v1  ;;  %v216_v7 = vmul.f32 %v175_v2, %v175_v2  ;;  %v217_v8 = vmul.f32 %v176_v3, %v176_v3  ;;  %v178_v9 = vld [vmem:[%s666_s29 + $0x20] sm:$0xff]  ;;  %v179_v13 = vld [vmem:[%s666_s29 + $0x28] sm:$0xff] }
  0x35   : > { %v218_v11 = vmul.f32 %v177_v4, %v177_v4  ;;  %v219_v15 = vmul.f32 %v178_v9, %v178_v9  ;;  %v180_v17 = vld [vmem:[%s666_s29 + $0x30] sm:$0xff]  ;;  %v220_v19 = vmul.f32 %v179_v13, %v179_v13  ;;  %v181_v21 = vld [vmem:[%s666_s29 + $0x38] sm:$0xff]  ;;  %v182_v25 = vld [vmem:[%s666_s29 + $0x40] sm:$0xff] }
  0x36   : > { %v192_v10 = vadd.f32 %v191_v5, %v176_v3  ;;  %v231_v12 = vadd.f32 %v216_v7, %v215_v6  ;;  %v221_v23 = vmul.f32 %v180_v17, %v180_v17  ;;  %v222_v27 = vmul.f32 %v181_v21, %v181_v21  ;;  %v183_v29 = vld [vmem:[%s666_s29 + $0x48] sm:$0xff]  ;;  %v184_v33 = vld [vmem:[%s666_s29 + $0x50] sm:$0xff]  ;;  %v185_v37 = vld [vmem:[%s666_s29 + $0x58] sm:$0xff] }
  0x37   : > { %v223_v31 = vmul.f32 %v182_v25, %v182_v25  ;;  %v224_v35 = vmul.f32 %v183_v29, %v183_v29  ;;  %v225_v39 = vmul.f32 %v184_v33, %v184_v33  ;;  %v186_v41 = vld [vmem:[%s666_s29 + $0x60] sm:$0xff]  ;;  %v226_v43 = vmul.f32 %v185_v37, %v185_v37  ;;  %v187_v45 = vld [vmem:[%s666_s29 + $0x68] sm:$0xff]  ;;  %v188_v49 = vld [vmem:[%s666_s29 + $0x70] sm:$0xff] }
  0x38   : > { %v193_v14 = vadd.f32 %v192_v10, %v177_v4  ;;  %v232_v16 = vadd.f32 %v231_v12, %v217_v8  ;;  %v227_v47 = vmul.f32 %v186_v41, %v186_v41  ;;  %v228_v51 = vmul.f32 %v187_v45, %v187_v45  ;;  %v189_v53 = vld [vmem:[%s666_s29 + $0x78] sm:$0xff] }
  0x39   : > { %v229_v55 = vmul.f32 %v188_v49, %v188_v49  ;;  %v230_v58 = vmul.f32 %v189_v53, %v189_v53  ;;  %v190_v7 = vld [vmem:[#allocation2] sm:$0x1]  ;;  %v214_v12 = vld [vmem:[#allocation3] sm:$0x1] }
  0x3a   : > { %v194_v18 = vadd.f32 %v193_v14, %v178_v9  ;;  %v233_v20 = vadd.f32 %v232_v16, %v218_v11 }
  0x3c   : > { %v195_v22 = vadd.f32 %v194_v18, %v179_v13  ;;  %v234_v24 = vadd.f32 %v233_v20, %v219_v15 }
  0x3e   : > { %v196_v26 = vadd.f32 %v195_v22, %v180_v17  ;;  %v235_v28 = vadd.f32 %v234_v24, %v220_v19 }
  0x40   : > { %v197_v30 = vadd.f32 %v196_v26, %v181_v21  ;;  %v236_v32 = vadd.f32 %v235_v28, %v221_v23 }
  0x42   : > { %v198_v34 = vadd.f32 %v197_v30, %v182_v25  ;;  %v237_v36 = vadd.f32 %v236_v32, %v222_v27 }
  0x44   : > { %v199_v38 = vadd.f32 %v198_v34, %v183_v29  ;;  %v238_v40 = vadd.f32 %v237_v36, %v223_v31 }
  0x46   : > { %v200_v42 = vadd.f32 %v199_v38, %v184_v33  ;;  %v239_v44 = vadd.f32 %v238_v40, %v224_v35 }
  0x48   : > { %v201_v46 = vadd.f32 %v200_v42, %v185_v37  ;;  %v240_v48 = vadd.f32 %v239_v44, %v225_v39 }
  0x4a   : > { %v202_v50 = vadd.f32 %v201_v46, %v186_v41  ;;  %v241_v52 = vadd.f32 %v240_v48, %v226_v43 }
  0x4c   : > { %v203_v54 = vadd.f32 %v202_v50, %v187_v45  ;;  %v242_v56 = vadd.f32 %v241_v52, %v227_v47 }
  0x4e   : > { %v204_v57 = vadd.f32 %v203_v54, %v188_v49  ;;  %v243_v59 = vadd.f32 %v242_v56, %v228_v51 }
  0x50   : > { %v205_v60 = vadd.f32 %v204_v57, %v189_v53  ;;  %v244_v61 = vadd.f32 %v243_v59, %v229_v55 }
  0x52   : > { %v206_v62 = vrot.slane %v205_v60, 4  ;;  %v245_v63 = vadd.f32 %v244_v61, %v230_v58 }
  0x54   : > { %v207_v0 = vadd.f32 %v206_v62, %v205_v60  ;;  %v246_v1 = vrot.slane %v245_v63, 4 }
  0x56   : > { %v208_v2 = vrot.slane %v207_v0, 2  ;;  %v247_v3 = vadd.f32 %v246_v1, %v245_v63 }
  0x58   : > { %v209_v4 = vadd.f32 %v208_v2, %v207_v0  ;;  %v248_v5 = vrot.slane %v247_v3, 2 }
  0x5a   : > { %v210_v6 = vrot.slane %v209_v4, 1  ;;  %v249_v8 = vadd.f32 %v248_v5, %v247_v3 }
  0x5c   : > { %v211_v9 = vadd.f32 %v210_v6, %v209_v4  ;;  %v250_v10 = vrot.slane %v249_v8, 1 }
  0x5e   : > { %v212_v11 = vadd.f32 %v211_v9, %v190_v7  ;;  %v251_v13 = vadd.f32 %v250_v10, %v249_v8  ;;  %257 = sbr.rel (%p362_p5) target bundleno = 137 (0x89), region = 44 }
  0x60   : > { %213 = vst [vmem:[#allocation2] sm:$0x1] %v212_v11  ;;  %v252_v14 = vadd.f32 %v251_v13, %v214_v12 }
  0x62   : > { %253 = vst [vmem:[#allocation3] sm:$0x1] %v252_v14 }
  0x63   : > { %v264_v27 = vld [vmem:[#allocation7] sm:$0x1]  ;;  %v278_v31 = vld [vmem:[#allocation7 + $0x1] sm:$0x1] }
  0x67   : > { %v258_v15 = vld [vmem:[#allocation2] sm:$0x1] }
  0x68   : > { %v259_v17 = vmul.f32 0.001953125, %v258_v15 }
  0x69   : > { %v260_v16 = vld [vmem:[#allocation3] sm:$0x1] }
  0x6a   : > { %v261_v18 = vmul.f32 0.001953125, %v260_v16  ;;  %v262_v19 = vmul.f32 %v259_v17, %v259_v17 }
  0x6c   : > { %v263_v20 = vsub.f32 %v261_v18, %v262_v19 }
  0x6e   : > { %v265_v21 = vadd.f32 0.001, %v263_v20 }
  0x70   : > { %428 = vrsqrt.f32 %v265_v21  ;;  %vm272_vm0 = vweird.f32 %v265_v21 }
  0x76   : > { %v429_v22 = vpop.eup %428 }
  0x77   : > { %v267_v23 = vmul.f32 %v429_v22, %v265_v21  ;;  %vm273_vm1 = vweird.f32 %v429_v22 }
  0x78   : > { %vm274_vm2 = vmor %vm272_vm0, %vm273_vm1 }
  0x79   : > { %v268_v24 = vmul.f32 %v429_v22, %v267_v23 }
  0x7b   : > { %v269_v25 = vmul.f32 0.5, %v268_v24 }
  0x7d   : > { %v270_v26 = vsub.f32 1.5, %v269_v25 }
  0x7f   : > { %v271_v28 = vmul.f32 %v429_v22, %v270_v26 }
  0x81   : > { %v275_v29 = vsel %vm274_vm2, %v429_v22, %v271_v28 }
  0x82   : > { %v276_v30 = vmul.f32 %v275_v29, %v264_v27 }
  0x84   : > { %277 = vst [vmem:[#allocation9] sm:$0x1] %v276_v30  ;;  %v279_v32 = vmul.f32 %v276_v30, %v259_v17 }
  0x86   : > { %v280_v33 = vsub.f32 %v278_v31, %v279_v32 }
  0x88   : > { %281 = vst [vmem:[#allocation9 + $0x1] sm:$0x1] %v280_v33 }
  0x89 PF: > { %p389_p8 = scmp.eq.s32.totalorder %s601_s13, 3  ;;  %s566_s19 = smov [#allocation9]  }
  0x8a   : > { %s288_s20 = sshll.u32 %s566_s19, 4  ;;  %s290_s3 = sshll.u32 %s714_s2, 4  ;;  %s289_s20 = int_to_ptr.vmem [resolvable:$true] %s288_s20  ;;  %s291_s3 = int_to_ptr.hbm [resolvable:$true] %s290_s3 }
  0x8b   : > { %375 = dma.vmem_to_hbm [thread:$0]  (%p389_p8), %s289_s20, 32, %s291_s3, [#allocation6]  }
  0x8c   : > { %543 = dma.done.wait (%p389_p8), [#allocation6], 32  }
  0x8d   : > { %545 = vsyncadd (%p389_p8), [#allocation6], 4294967264 }
  0x8e PF: > { %p14_p9 = scmp.ge.s32.totalorder %s604_s14, 6   ;;  %s719_s9 = smov %s552_s10 }
  0x8f   : > { %s720_s10 = smov %s556_s11  ;;  %s721_s11 = smov %s614_s17 }
  0x90   : > { %s722_s12 = smov %s604_s14  ;;  %16 = sbr.rel (!%p14_p9) target bundleno = 5 (0x5), region = 77 }
  0x95   :  { %304 = vsyncpa [#allocation5], 1 }
  0x96   :  { %306 = vsyncpa [#allocation5 + $0x1], 1 }
  0x97   :  { %307 = vsyncpa [#allocation8], 1 }
  0x98   :  { %308 = vsyncpa [#allocation6], 1 }
  0x99   :  { %310 = vsyncpa [#allocation6 + $0x1], 1 }

</bundles_post_ra>
